<compile_context>
chip_gen: v7x
topology: tpu7x:2x2x1
jax: 0.10.0
libtpu: 0.0.40
codegen_flags: <defaults>
</compile_context>

<pallas_src>
import functools

import jax
import jax.numpy as jnp
from jax import lax
from jax.experimental import pallas as pl
from jax.experimental.pallas import tpu as pltpu

EPS = 1e-5


def downblock_kernel(xw_ref, mask_ref, w1_ref, g1_ref, be1_ref,
                     w2_ref, g2_ref, be2_ref, o_ref, tap1_ref, tap2_ref, *, wo):
    """All activations are (C, P) slabs, P = N*Ho*Wo on lanes.

    xw_ref:   (2, 2, Cin, P)     the 4 positions of each 2x2 pool window
    mask_ref: (9, 1, P)          float border-validity mask per conv tap
    w1_ref:   (Cout, 9*Cin)      conv1 weights, im2col layout (tap-major, ch-minor)
    w2_ref:   (Cout, 9*Cout)     conv2 weights, same layout
    g/be:     (Cout, 1)          BN gamma / beta
    o_ref:    (Cout, P)          lane-dense output
    tap*_ref: (9*Cin, P)/(9*Cout, P) VMEM scratch im2col slabs
    """
    p_total = o_ref.shape[1]

    # --- MaxPool2d(2): elementwise max over the 4 pool-window slabs (VPU) ---
    xp = jnp.maximum(jnp.maximum(xw_ref[0, 0], xw_ref[0, 1]),
                     jnp.maximum(xw_ref[1, 0], xw_ref[1, 1]))      # (Cin, P)

    def conv_bn_relu(x, w_ref, g, be, taps_ref):
        # Conv2d(3x3, padding=1): each tap is the input rolled along the
        # flattened lane axis (XLU) with out-of-image positions zeroed.  The 9
        # taps are stacked into one (9*C, P) slab and contracted in a single
        # MXU matmul.  (Conv bias omitted: cancels under training-mode BN.)
        c_in = x.shape[0]
        t = 0
        for kh in range(3):
            for kw in range(3):
                delta = (kh - 1) * wo + (kw - 1)
                if delta == 0:
                    tap = x                                        # center: mask == 1
                else:
                    tap = pltpu.roll(x, (-delta) % p_total, 1) * mask_ref[t]
                taps_ref[t * c_in:(t + 1) * c_in, :] = tap         # static sublane offset
                t += 1
        acc = jnp.dot(w_ref[...], taps_ref[...],
                      preferred_element_type=jnp.float32,
                      precision=lax.Precision.HIGHEST)             # (Cout, P)

        # BatchNorm2d (training mode): per-channel batch mean / biased variance
        # over all N*Ho*Wo positions, one reduction pass.
        inv_p = 1.0 / p_total
        mu = jnp.sum(acc, axis=1, keepdims=True) * inv_p
        ex2 = jnp.sum(acc * acc, axis=1, keepdims=True) * inv_p
        var = ex2 - mu * mu
        y = (acc - mu) * lax.rsqrt(var + EPS) * g + be
        return jnp.maximum(y, 0.0)                                 # ReLU

    h1 = conv_bn_relu(xp, w1_ref, g1_ref[...], be1_ref[...], tap1_ref)
    h2 = conv_bn_relu(h1, w2_ref, g2_ref[...], be2_ref[...], tap2_ref)
    o_ref[...] = h2.astype(o_ref.dtype)


@jax.jit
def downblock_pallas(x_nchw, params):
    n, cin, h, w = x_nchw.shape
    ho, wo = h // 2, w // 2          # MaxPool2d(2); assumes even H, W (as in UNet)
    p_total = n * ho * wo
    cout = params["w1"].shape[0]

    xf = x_nchw.astype(jnp.float32)
    # (N, Cin, H, W) -> (2, 2, Cin, P): one small transpose that both exposes
    # the 2x2 pool-window positions and puts the flattened dim P on lanes.
    xw = xf.reshape(n, cin, ho, 2, wo, 2).transpose(3, 5, 1, 0, 2, 4)
    xw = xw.reshape(2, 2, cin, p_total)

    # Border-validity masks for the 9 conv taps (shape-only -> constant-folded).
    pp = jnp.arange(p_total, dtype=jnp.int32)
    jj = pp % wo
    ii = (pp // wo) % ho
    masks = []
    for kh in range(3):
        for kw in range(3):
            di, dj = kh - 1, kw - 1
            masks.append((ii + di >= 0) & (ii + di < ho)
                         & (jj + dj >= 0) & (jj + dj < wo))
    mask_arr = jnp.stack(masks).astype(jnp.float32).reshape(9, 1, p_total)

    # PyTorch OIHW conv weights -> one im2col matrix per conv:
    # W_big[o, t*C + c] = w[o, c, kh, kw],  t = kh*3 + kw.
    w1 = jnp.transpose(params["w1"], (0, 2, 3, 1)).reshape(cout, 9 * cin)
    w2 = jnp.transpose(params["w2"], (0, 2, 3, 1)).reshape(cout, 9 * cout)
    col = lambda v: v.reshape(-1, 1).astype(jnp.float32)           # (Cout, 1)

    # NOTE: conv biases b1/b2 are intentionally NOT passed — they cancel
    # exactly under training-mode BatchNorm (mean subtraction).
    args = (xw, mask_arr,
            w1.astype(jnp.float32), col(params["g1"]), col(params["be1"]),
            w2.astype(jnp.float32), col(params["g2"]), col(params["be2"]))

    vmem = pl.BlockSpec(memory_space=pltpu.MemorySpace.VMEM)
    out_cp = pl.pallas_call(
        functools.partial(downblock_kernel, wo=wo),
        out_shape=jax.ShapeDtypeStruct((cout, p_total), jnp.float32),
        in_specs=[vmem] * len(args),
        out_specs=vmem,
        scratch_shapes=[pltpu.VMEM((9 * cin, p_total), jnp.float32),
                        pltpu.VMEM((9 * cout, p_total), jnp.float32)],
        compiler_params=pltpu.CompilerParams(
            # Budgeted for v7x's 64 MiB VMEM (leaves headroom); trivially fits
            # at this test size and still fine on v5e/v6e.
            vmem_limit_bytes=48 * 1024 * 1024),
    )(*args)

    # (Cout, N*Ho*Wo) -> NCHW
    return out_cp.reshape(cout, n, ho, wo).transpose(1, 0, 2, 3)


def ref_downblock(x, p):
    """Pure-JAX reference matching the PyTorch module (training-mode BN)."""
    n, c, h, w = x.shape
    xp = x.reshape(n, c, h // 2, 2, w // 2, 2).max(axis=(3, 5))

    def conv_bn_relu(z, wgt, b, g, be):
        y = lax.conv_general_dilated(z, wgt, (1, 1), "SAME",
                                     dimension_numbers=("NCHW", "OIHW", "NCHW"),
                                     precision=lax.Precision.HIGHEST)
        y = y + b[None, :, None, None]
        mu = y.mean(axis=(0, 2, 3), keepdims=True)
        var = ((y - mu) ** 2).mean(axis=(0, 2, 3), keepdims=True)
        y = (y - mu) / jnp.sqrt(var + EPS)
        y = y * g[None, :, None, None] + be[None, :, None, None]
        return jnp.maximum(y, 0.0)

    y = conv_bn_relu(xp, p["w1"], p["b1"], p["g1"], p["be1"])
    y = conv_bn_relu(y, p["w2"], p["b2"], p["g2"], p["be2"])
    return y


if __name__ == "__main__":
    N, CIN, COUT, H, W = 2, 4, 8, 16, 16

    key = jax.random.PRNGKey(0)
    ks = jax.random.split(key, 9)
    params = dict(
        w1=0.1 * jax.random.normal(ks[0], (COUT, CIN, 3, 3), jnp.float32),
        b1=0.1 * jax.random.normal(ks[1], (COUT,), jnp.float32),
        g1=1.0 + 0.1 * jax.random.normal(ks[2], (COUT,), jnp.float32),
        be1=0.1 * jax.random.normal(ks[3], (COUT,), jnp.float32),
        w2=0.1 * jax.random.normal(ks[4], (COUT, COUT, 3, 3), jnp.float32),
        b2=0.1 * jax.random.normal(ks[5], (COUT,), jnp.float32),
        g2=1.0 + 0.1 * jax.random.normal(ks[6], (COUT,), jnp.float32),
        be2=0.1 * jax.random.normal(ks[7], (COUT,), jnp.float32),
    )
    x = jax.random.normal(ks[8], (N, CIN, H, W), jnp.float32)

    out = jax.block_until_ready(downblock_pallas(x, params))
    assert out.shape == (N, COUT, H // 2, W // 2), out.shape

    ref = ref_downblock(x, params)
    # HIGHEST-precision MXU matmuls let us keep a tight tolerance; the residual
    # error is f32 rounding (rsqrt vs divide, one-pass vs two-pass variance).
    max_err = float(jnp.max(jnp.abs(out - ref)))
    if max_err > 1e-3:
        raise AssertionError(f"Pallas kernel mismatch vs reference: max_err={max_err}")

    print("KERNEL_OK")
</pallas_src>

<mosaic_0001>
module attributes {stable_mosaic.version = 11 : i64} {
  func.func @downblock_kernel(%arg0: memref<2x2x4x128xf32, #tpu.memory_space<vmem>>, %arg1: memref<9x1x128xf32, #tpu.memory_space<vmem>>, %arg2: memref<8x36xf32, #tpu.memory_space<vmem>>, %arg3: memref<8x1xf32, #tpu.memory_space<vmem>>, %arg4: memref<8x1xf32, #tpu.memory_space<vmem>>, %arg5: memref<8x72xf32, #tpu.memory_space<vmem>>, %arg6: memref<8x1xf32, #tpu.memory_space<vmem>>, %arg7: memref<8x1xf32, #tpu.memory_space<vmem>>, %arg8: memref<8x128xf32, #tpu.memory_space<vmem>>, %arg9: memref<36x128xf32, #tpu.memory_space<vmem>>, %arg10: memref<72x128xf32, #tpu.memory_space<vmem>>) attributes {dimension_semantics = [], scalar_prefetch = 0 : i64, scratch_operands = 2 : i64, tpu.core_type = #tpu.core_type<tc>} {
    %c0 = arith.constant 0 : index
    %c0_0 = arith.constant 0 : index
    %c0_1 = arith.constant 0 : index
    %c0_2 = arith.constant 0 : index
    %0 = vector.load %arg0[%c0, %c0_0, %c0_1, %c0_2] : memref<2x2x4x128xf32, #tpu.memory_space<vmem>>, vector<1x1x4x128xf32>
    %1 = vector.shape_cast %0 : vector<1x1x4x128xf32> to vector<4x128xf32>
    %c0_3 = arith.constant 0 : index
    %c1 = arith.constant 1 : index
    %c0_4 = arith.constant 0 : index
    %c0_5 = arith.constant 0 : index
    %2 = vector.load %arg0[%c0_3, %c1, %c0_4, %c0_5] : memref<2x2x4x128xf32, #tpu.memory_space<vmem>>, vector<1x1x4x128xf32>
    %3 = vector.shape_cast %2 : vector<1x1x4x128xf32> to vector<4x128xf32>
    %4 = arith.maximumf %1, %3 : vector<4x128xf32>
    %c1_6 = arith.constant 1 : index
    %c0_7 = arith.constant 0 : index
    %c0_8 = arith.constant 0 : index
    %c0_9 = arith.constant 0 : index
    %5 = vector.load %arg0[%c1_6, %c0_7, %c0_8, %c0_9] : memref<2x2x4x128xf32, #tpu.memory_space<vmem>>, vector<1x1x4x128xf32>
    %6 = vector.shape_cast %5 : vector<1x1x4x128xf32> to vector<4x128xf32>
    %c1_10 = arith.constant 1 : index
    %c1_11 = arith.constant 1 : index
    %c0_12 = arith.constant 0 : index
    %c0_13 = arith.constant 0 : index
    %7 = vector.load %arg0[%c1_10, %c1_11, %c0_12, %c0_13] : memref<2x2x4x128xf32, #tpu.memory_space<vmem>>, vector<1x1x4x128xf32>
    %8 = vector.shape_cast %7 : vector<1x1x4x128xf32> to vector<4x128xf32>
    %9 = arith.maximumf %6, %8 : vector<4x128xf32>
    %10 = arith.maximumf %4, %9 : vector<4x128xf32>
    %c0_14 = arith.constant 0 : index
    %c0_15 = arith.constant 0 : index
    %11 = vector.load %arg3[%c0_14, %c0_15] : memref<8x1xf32, #tpu.memory_space<vmem>>, vector<8x1xf32>
    %c0_16 = arith.constant 0 : index
    %c0_17 = arith.constant 0 : index
    %12 = vector.load %arg4[%c0_16, %c0_17] : memref<8x1xf32, #tpu.memory_space<vmem>>, vector<8x1xf32>
    %c9_i32 = arith.constant 9 : i32
    %13 = tpu.dynamic_rotate %10 by %c9_i32 dim 1 : vector<4x128xf32>, i32 -> vector<4x128xf32>
    %c0_18 = arith.constant 0 : index
    %c0_19 = arith.constant 0 : index
    %c0_20 = arith.constant 0 : index
    %14 = vector.load %arg1[%c0_18, %c0_19, %c0_20] : memref<9x1x128xf32, #tpu.memory_space<vmem>>, vector<1x1x128xf32>
    %15 = vector.shape_cast %14 : vector<1x1x128xf32> to vector<1x128xf32>
    %16 = vector.broadcast %15 : vector<1x128xf32> to vector<4x128xf32>
    %17 = arith.mulf %13, %16 : vector<4x128xf32>
    %c0_21 = arith.constant 0 : index
    %c0_22 = arith.constant 0 : index
    %18 = vector.load %arg9[%c0_21, %c0_22] : memref<36x128xf32, #tpu.memory_space<vmem>>, vector<4x128xf32>
    tpu.vector_store %arg9[%c0_21, %c0_22], %17 {strides = array<i32>} : memref<36x128xf32, #tpu.memory_space<vmem>>, vector<4x128xf32>,
    %c8_i32 = arith.constant 8 : i32
    %19 = tpu.dynamic_rotate %10 by %c8_i32 dim 1 : vector<4x128xf32>, i32 -> vector<4x128xf32>
    %c1_23 = arith.constant 1 : index
    %c0_24 = arith.constant 0 : index
    %c0_25 = arith.constant 0 : index
    %20 = vector.load %arg1[%c1_23, %c0_24, %c0_25] : memref<9x1x128xf32, #tpu.memory_space<vmem>>, vector<1x1x128xf32>
    %21 = vector.shape_cast %20 : vector<1x1x128xf32> to vector<1x128xf32>
    %22 = vector.broadcast %21 : vector<1x128xf32> to vector<4x128xf32>
    %23 = arith.mulf %19, %22 : vector<4x128xf32>
    %c4 = arith.constant 4 : index
    %c0_26 = arith.constant 0 : index
    %24 = vector.load %arg9[%c4, %c0_26] : memref<36x128xf32, #tpu.memory_space<vmem>>, vector<4x128xf32>
    tpu.vector_store %arg9[%c4, %c0_26], %23 {strides = array<i32>} : memref<36x128xf32, #tpu.memory_space<vmem>>, vector<4x128xf32>,
    %c7_i32 = arith.constant 7 : i32
    %25 = tpu.dynamic_rotate %10 by %c7_i32 dim 1 : vector<4x128xf32>, i32 -> vector<4x128xf32>
    %c2 = arith.constant 2 : index
    %c0_27 = arith.constant 0 : index
    %c0_28 = arith.constant 0 : index
    %26 = vector.load %arg1[%c2, %c0_27, %c0_28] : memref<9x1x128xf32, #tpu.memory_space<vmem>>, vector<1x1x128xf32>
    %27 = vector.shape_cast %26 : vector<1x1x128xf32> to vector<1x128xf32>
    %28 = vector.broadcast %27 : vector<1x128xf32> to vector<4x128xf32>
    %29 = arith.mulf %25, %28 : vector<4x128xf32>
    %c8 = arith.constant 8 : index
    %c0_29 = arith.constant 0 : index
    %30 = vector.load %arg9[%c8, %c0_29] : memref<36x128xf32, #tpu.memory_space<vmem>>, vector<4x128xf32>
    tpu.vector_store %arg9[%c8, %c0_29], %29 {strides = array<i32>} : memref<36x128xf32, #tpu.memory_space<vmem>>, vector<4x128xf32>,
    %c1_i32 = arith.constant 1 : i32
    %31 = tpu.dynamic_rotate %10 by %c1_i32 dim 1 : vector<4x128xf32>, i32 -> vector<4x128xf32>
    %c3 = arith.constant 3 : index
    %c0_30 = arith.constant 0 : index
    %c0_31 = arith.constant 0 : index
    %32 = vector.load %arg1[%c3, %c0_30, %c0_31] : memref<9x1x128xf32, #tpu.memory_space<vmem>>, vector<1x1x128xf32>
    %33 = vector.shape_cast %32 : vector<1x1x128xf32> to vector<1x128xf32>
    %34 = vector.broadcast %33 : vector<1x128xf32> to vector<4x128xf32>
    %35 = arith.mulf %31, %34 : vector<4x128xf32>
    %c12 = arith.constant 12 : index
    %c0_32 = arith.constant 0 : index
    %36 = vector.load %arg9[%c12, %c0_32] : memref<36x128xf32, #tpu.memory_space<vmem>>, vector<4x128xf32>
    tpu.vector_store %arg9[%c12, %c0_32], %35 {strides = array<i32>} : memref<36x128xf32, #tpu.memory_space<vmem>>, vector<4x128xf32>,
    %c16 = arith.constant 16 : index
    %c0_33 = arith.constant 0 : index
    %37 = vector.load %arg9[%c16, %c0_33] : memref<36x128xf32, #tpu.memory_space<vmem>>, vector<4x128xf32>
    tpu.vector_store %arg9[%c16, %c0_33], %10 {strides = array<i32>} : memref<36x128xf32, #tpu.memory_space<vmem>>, vector<4x128xf32>,
    %c127_i32 = arith.constant 127 : i32
    %38 = tpu.dynamic_rotate %10 by %c127_i32 dim 1 : vector<4x128xf32>, i32 -> vector<4x128xf32>
    %c5 = arith.constant 5 : index
    %c0_34 = arith.constant 0 : index
    %c0_35 = arith.constant 0 : index
    %39 = vector.load %arg1[%c5, %c0_34, %c0_35] : memref<9x1x128xf32, #tpu.memory_space<vmem>>, vector<1x1x128xf32>
    %40 = vector.shape_cast %39 : vector<1x1x128xf32> to vector<1x128xf32>
    %41 = vector.broadcast %40 : vector<1x128xf32> to vector<4x128xf32>
    %42 = arith.mulf %38, %41 : vector<4x128xf32>
    %c20 = arith.constant 20 : index
    %c0_36 = arith.constant 0 : index
    %43 = vector.load %arg9[%c20, %c0_36] : memref<36x128xf32, #tpu.memory_space<vmem>>, vector<4x128xf32>
    tpu.vector_store %arg9[%c20, %c0_36], %42 {strides = array<i32>} : memref<36x128xf32, #tpu.memory_space<vmem>>, vector<4x128xf32>,
    %c121_i32 = arith.constant 121 : i32
    %44 = tpu.dynamic_rotate %10 by %c121_i32 dim 1 : vector<4x128xf32>, i32 -> vector<4x128xf32>
    %c6 = arith.constant 6 : index
    %c0_37 = arith.constant 0 : index
    %c0_38 = arith.constant 0 : index
    %45 = vector.load %arg1[%c6, %c0_37, %c0_38] : memref<9x1x128xf32, #tpu.memory_space<vmem>>, vector<1x1x128xf32>
    %46 = vector.shape_cast %45 : vector<1x1x128xf32> to vector<1x128xf32>
    %47 = vector.broadcast %46 : vector<1x128xf32> to vector<4x128xf32>
    %48 = arith.mulf %44, %47 : vector<4x128xf32>
    %c24 = arith.constant 24 : index
    %c0_39 = arith.constant 0 : index
    %49 = vector.load %arg9[%c24, %c0_39] : memref<36x128xf32, #tpu.memory_space<vmem>>, vector<4x128xf32>
    tpu.vector_store %arg9[%c24, %c0_39], %48 {strides = array<i32>} : memref<36x128xf32, #tpu.memory_space<vmem>>, vector<4x128xf32>,
    %c120_i32 = arith.constant 120 : i32
    %50 = tpu.dynamic_rotate %10 by %c120_i32 dim 1 : vector<4x128xf32>, i32 -> vector<4x128xf32>
    %c7 = arith.constant 7 : index
    %c0_40 = arith.constant 0 : index
    %c0_41 = arith.constant 0 : index
    %51 = vector.load %arg1[%c7, %c0_40, %c0_41] : memref<9x1x128xf32, #tpu.memory_space<vmem>>, vector<1x1x128xf32>
    %52 = vector.shape_cast %51 : vector<1x1x128xf32> to vector<1x128xf32>
    %53 = vector.broadcast %52 : vector<1x128xf32> to vector<4x128xf32>
    %54 = arith.mulf %50, %53 : vector<4x128xf32>
    %c28 = arith.constant 28 : index
    %c0_42 = arith.constant 0 : index
    %55 = vector.load %arg9[%c28, %c0_42] : memref<36x128xf32, #tpu.memory_space<vmem>>, vector<4x128xf32>
    tpu.vector_store %arg9[%c28, %c0_42], %54 {strides = array<i32>} : memref<36x128xf32, #tpu.memory_space<vmem>>, vector<4x128xf32>,
    %c119_i32 = arith.constant 119 : i32
    %56 = tpu.dynamic_rotate %10 by %c119_i32 dim 1 : vector<4x128xf32>, i32 -> vector<4x128xf32>
    %c8_43 = arith.constant 8 : index
    %c0_44 = arith.constant 0 : index
    %c0_45 = arith.constant 0 : index
    %57 = vector.load %arg1[%c8_43, %c0_44, %c0_45] : memref<9x1x128xf32, #tpu.memory_space<vmem>>, vector<1x1x128xf32>
    %58 = vector.shape_cast %57 : vector<1x1x128xf32> to vector<1x128xf32>
    %59 = vector.broadcast %58 : vector<1x128xf32> to vector<4x128xf32>
    %60 = arith.mulf %56, %59 : vector<4x128xf32>
    %c32 = arith.constant 32 : index
    %c0_46 = arith.constant 0 : index
    %61 = vector.load %arg9[%c32, %c0_46] : memref<36x128xf32, #tpu.memory_space<vmem>>, vector<4x128xf32>
    tpu.vector_store %arg9[%c32, %c0_46], %60 {strides = array<i32>} : memref<36x128xf32, #tpu.memory_space<vmem>>, vector<4x128xf32>,
    %c0_47 = arith.constant 0 : index
    %c0_48 = arith.constant 0 : index
    %62 = vector.load %arg2[%c0_47, %c0_48] : memref<8x36xf32, #tpu.memory_space<vmem>>, vector<8x36xf32>
    %c0_49 = arith.constant 0 : index
    %c0_50 = arith.constant 0 : index
    %63 = vector.load %arg9[%c0_49, %c0_50] : memref<36x128xf32, #tpu.memory_space<vmem>>, vector<36x128xf32>
    %cst = arith.constant dense<0.000000e+00> : vector<8x128xf32>
    %64 = tpu.matmul %62, %63, %cst {dimension_numbers = #tpu.dot_dimension_numbers<[1], [0], [0], [1], [0, 0, 1, 1], [], []>, precision = #tpu.contract_precision<fp32>} : vector<8x36xf32>, vector<36x128xf32>, vector<8x128xf32> -> vector<8x128xf32>
    %cst_51 = arith.constant dense<0.000000e+00> : vector<8xf32>
    %65 = vector.multi_reduction <add>, %64, %cst_51 [1] : vector<8x128xf32> to vector<8xf32>
    %66 = vector.shape_cast %65 : vector<8xf32> to vector<8x1xf32>
    %cst_52 = arith.constant 7.812500e-03 : f32
    %67 = vector.broadcast %cst_52 : f32 to vector<8x1xf32>
    %68 = arith.mulf %66, %67 : vector<8x1xf32>
    %69 = arith.mulf %64, %64 : vector<8x128xf32>
    %cst_53 = arith.constant dense<0.000000e+00> : vector<8xf32>
    %70 = vector.multi_reduction <add>, %69, %cst_53 [1] : vector<8x128xf32> to vector<8xf32>
    %71 = vector.shape_cast %70 : vector<8xf32> to vector<8x1xf32>
    %cst_54 = arith.constant 7.812500e-03 : f32
    %72 = vector.broadcast %cst_54 : f32 to vector<8x1xf32>
    %73 = arith.mulf %71, %72 : vector<8x1xf32>
    %74 = arith.mulf %68, %68 : vector<8x1xf32>
    %75 = arith.subf %73, %74 : vector<8x1xf32>
    %76 = vector.broadcast %68 : vector<8x1xf32> to vector<8x128xf32>
    %77 = arith.subf %64, %76 : vector<8x128xf32>
    %cst_55 = arith.constant 9.99999974E-6 : f32
    %78 = vector.broadcast %cst_55 : f32 to vector<8x1xf32>
    %79 = arith.addf %75, %78 : vector<8x1xf32>
    %80 = math.rsqrt %79 : vector<8x1xf32>
    %81 = vector.broadcast %80 : vector<8x1xf32> to vector<8x128xf32>
    %82 = arith.mulf %77, %81 : vector<8x128xf32>
    %83 = vector.broadcast %11 : vector<8x1xf32> to vector<8x128xf32>
    %84 = arith.mulf %82, %83 : vector<8x128xf32>
    %85 = vector.broadcast %12 : vector<8x1xf32> to vector<8x128xf32>
    %86 = arith.addf %84, %85 : vector<8x128xf32>
    %cst_56 = arith.constant 0.000000e+00 : f32
    %87 = vector.broadcast %cst_56 : f32 to vector<8x128xf32>
    %88 = arith.maximumf %86, %87 : vector<8x128xf32>
    %c0_57 = arith.constant 0 : index
    %c0_58 = arith.constant 0 : index
    %89 = vector.load %arg6[%c0_57, %c0_58] : memref<8x1xf32, #tpu.memory_space<vmem>>, vector<8x1xf32>
    %c0_59 = arith.constant 0 : index
    %c0_60 = arith.constant 0 : index
    %90 = vector.load %arg7[%c0_59, %c0_60] : memref<8x1xf32, #tpu.memory_space<vmem>>, vector<8x1xf32>
    %c9_i32_61 = arith.constant 9 : i32
    %91 = tpu.dynamic_rotate %88 by %c9_i32_61 dim 1 : vector<8x128xf32>, i32 -> vector<8x128xf32>
    %c0_62 = arith.constant 0 : index
    %c0_63 = arith.constant 0 : index
    %c0_64 = arith.constant 0 : index
    %92 = vector.load %arg1[%c0_62, %c0_63, %c0_64] : memref<9x1x128xf32, #tpu.memory_space<vmem>>, vector<1x1x128xf32>
    %93 = vector.shape_cast %92 : vector<1x1x128xf32> to vector<1x128xf32>
    %94 = vector.broadcast %93 : vector<1x128xf32> to vector<8x128xf32>
    %95 = arith.mulf %91, %94 : vector<8x128xf32>
    %c0_65 = arith.constant 0 : index
    %c0_66 = arith.constant 0 : index
    %96 = vector.load %arg10[%c0_65, %c0_66] : memref<72x128xf32, #tpu.memory_space<vmem>>, vector<8x128xf32>
    tpu.vector_store %arg10[%c0_65, %c0_66], %95 {strides = array<i32>} : memref<72x128xf32, #tpu.memory_space<vmem>>, vector<8x128xf32>,
    %c8_i32_67 = arith.constant 8 : i32
    %97 = tpu.dynamic_rotate %88 by %c8_i32_67 dim 1 : vector<8x128xf32>, i32 -> vector<8x128xf32>
    %c1_68 = arith.constant 1 : index
    %c0_69 = arith.constant 0 : index
    %c0_70 = arith.constant 0 : index
    %98 = vector.load %arg1[%c1_68, %c0_69, %c0_70] : memref<9x1x128xf32, #tpu.memory_space<vmem>>, vector<1x1x128xf32>
    %99 = vector.shape_cast %98 : vector<1x1x128xf32> to vector<1x128xf32>
    %100 = vector.broadcast %99 : vector<1x128xf32> to vector<8x128xf32>
    %101 = arith.mulf %97, %100 : vector<8x128xf32>
    %c8_71 = arith.constant 8 : index
    %c0_72 = arith.constant 0 : index
    %102 = vector.load %arg10[%c8_71, %c0_72] : memref<72x128xf32, #tpu.memory_space<vmem>>, vector<8x128xf32>
    tpu.vector_store %arg10[%c8_71, %c0_72], %101 {strides = array<i32>} : memref<72x128xf32, #tpu.memory_space<vmem>>, vector<8x128xf32>,
    %c7_i32_73 = arith.constant 7 : i32
    %103 = tpu.dynamic_rotate %88 by %c7_i32_73 dim 1 : vector<8x128xf32>, i32 -> vector<8x128xf32>
    %c2_74 = arith.constant 2 : index
    %c0_75 = arith.constant 0 : index
    %c0_76 = arith.constant 0 : index
    %104 = vector.load %arg1[%c2_74, %c0_75, %c0_76] : memref<9x1x128xf32, #tpu.memory_space<vmem>>, vector<1x1x128xf32>
    %105 = vector.shape_cast %104 : vector<1x1x128xf32> to vector<1x128xf32>
    %106 = vector.broadcast %105 : vector<1x128xf32> to vector<8x128xf32>
    %107 = arith.mulf %103, %106 : vector<8x128xf32>
    %c16_77 = arith.constant 16 : index
    %c0_78 = arith.constant 0 : index
    %108 = vector.load %arg10[%c16_77, %c0_78] : memref<72x128xf32, #tpu.memory_space<vmem>>, vector<8x128xf32>
    tpu.vector_store %arg10[%c16_77, %c0_78], %107 {strides = array<i32>} : memref<72x128xf32, #tpu.memory_space<vmem>>, vector<8x128xf32>,
    %c1_i32_79 = arith.constant 1 : i32
    %109 = tpu.dynamic_rotate %88 by %c1_i32_79 dim 1 : vector<8x128xf32>, i32 -> vector<8x128xf32>
    %c3_80 = arith.constant 3 : index
    %c0_81 = arith.constant 0 : index
    %c0_82 = arith.constant 0 : index
    %110 = vector.load %arg1[%c3_80, %c0_81, %c0_82] : memref<9x1x128xf32, #tpu.memory_space<vmem>>, vector<1x1x128xf32>
    %111 = vector.shape_cast %110 : vector<1x1x128xf32> to vector<1x128xf32>
    %112 = vector.broadcast %111 : vector<1x128xf32> to vector<8x128xf32>
    %113 = arith.mulf %109, %112 : vector<8x128xf32>
    %c24_83 = arith.constant 24 : index
    %c0_84 = arith.constant 0 : index
    %114 = vector.load %arg10[%c24_83, %c0_84] : memref<72x128xf32, #tpu.memory_space<vmem>>, vector<8x128xf32>
    tpu.vector_store %arg10[%c24_83, %c0_84], %113 {strides = array<i32>} : memref<72x128xf32, #tpu.memory_space<vmem>>, vector<8x128xf32>,
    %c32_85 = arith.constant 32 : index
    %c0_86 = arith.constant 0 : index
    %115 = vector.load %arg10[%c32_85, %c0_86] : memref<72x128xf32, #tpu.memory_space<vmem>>, vector<8x128xf32>
    tpu.vector_store %arg10[%c32_85, %c0_86], %88 {strides = array<i32>} : memref<72x128xf32, #tpu.memory_space<vmem>>, vector<8x128xf32>,
    %c127_i32_87 = arith.constant 127 : i32
    %116 = tpu.dynamic_rotate %88 by %c127_i32_87 dim 1 : vector<8x128xf32>, i32 -> vector<8x128xf32>
    %c5_88 = arith.constant 5 : index
    %c0_89 = arith.constant 0 : index
    %c0_90 = arith.constant 0 : index
    %117 = vector.load %arg1[%c5_88, %c0_89, %c0_90] : memref<9x1x128xf32, #tpu.memory_space<vmem>>, vector<1x1x128xf32>
    %118 = vector.shape_cast %117 : vector<1x1x128xf32> to vector<1x128xf32>
    %119 = vector.broadcast %118 : vector<1x128xf32> to vector<8x128xf32>
    %120 = arith.mulf %116, %119 : vector<8x128xf32>
    %c40 = arith.constant 40 : index
    %c0_91 = arith.constant 0 : index
    %121 = vector.load %arg10[%c40, %c0_91] : memref<72x128xf32, #tpu.memory_space<vmem>>, vector<8x128xf32>
    tpu.vector_store %arg10[%c40, %c0_91], %120 {strides = array<i32>} : memref<72x128xf32, #tpu.memory_space<vmem>>, vector<8x128xf32>,
    %c121_i32_92 = arith.constant 121 : i32
    %122 = tpu.dynamic_rotate %88 by %c121_i32_92 dim 1 : vector<8x128xf32>, i32 -> vector<8x128xf32>
    %c6_93 = arith.constant 6 : index
    %c0_94 = arith.constant 0 : index
    %c0_95 = arith.constant 0 : index
    %123 = vector.load %arg1[%c6_93, %c0_94, %c0_95] : memref<9x1x128xf32, #tpu.memory_space<vmem>>, vector<1x1x128xf32>
    %124 = vector.shape_cast %123 : vector<1x1x128xf32> to vector<1x128xf32>
    %125 = vector.broadcast %124 : vector<1x128xf32> to vector<8x128xf32>
    %126 = arith.mulf %122, %125 : vector<8x128xf32>
    %c48 = arith.constant 48 : index
    %c0_96 = arith.constant 0 : index
    %127 = vector.load %arg10[%c48, %c0_96] : memref<72x128xf32, #tpu.memory_space<vmem>>, vector<8x128xf32>
    tpu.vector_store %arg10[%c48, %c0_96], %126 {strides = array<i32>} : memref<72x128xf32, #tpu.memory_space<vmem>>, vector<8x128xf32>,
    %c120_i32_97 = arith.constant 120 : i32
    %128 = tpu.dynamic_rotate %88 by %c120_i32_97 dim 1 : vector<8x128xf32>, i32 -> vector<8x128xf32>
    %c7_98 = arith.constant 7 : index
    %c0_99 = arith.constant 0 : index
    %c0_100 = arith.constant 0 : index
    %129 = vector.load %arg1[%c7_98, %c0_99, %c0_100] : memref<9x1x128xf32, #tpu.memory_space<vmem>>, vector<1x1x128xf32>
    %130 = vector.shape_cast %129 : vector<1x1x128xf32> to vector<1x128xf32>
    %131 = vector.broadcast %130 : vector<1x128xf32> to vector<8x128xf32>
    %132 = arith.mulf %128, %131 : vector<8x128xf32>
    %c56 = arith.constant 56 : index
    %c0_101 = arith.constant 0 : index
    %133 = vector.load %arg10[%c56, %c0_101] : memref<72x128xf32, #tpu.memory_space<vmem>>, vector<8x128xf32>
    tpu.vector_store %arg10[%c56, %c0_101], %132 {strides = array<i32>} : memref<72x128xf32, #tpu.memory_space<vmem>>, vector<8x128xf32>,
    %c119_i32_102 = arith.constant 119 : i32
    %134 = tpu.dynamic_rotate %88 by %c119_i32_102 dim 1 : vector<8x128xf32>, i32 -> vector<8x128xf32>
    %c8_103 = arith.constant 8 : index
    %c0_104 = arith.constant 0 : index
    %c0_105 = arith.constant 0 : index
    %135 = vector.load %arg1[%c8_103, %c0_104, %c0_105] : memref<9x1x128xf32, #tpu.memory_space<vmem>>, vector<1x1x128xf32>
    %136 = vector.shape_cast %135 : vector<1x1x128xf32> to vector<1x128xf32>
    %137 = vector.broadcast %136 : vector<1x128xf32> to vector<8x128xf32>
    %138 = arith.mulf %134, %137 : vector<8x128xf32>
    %c64 = arith.constant 64 : index
    %c0_106 = arith.constant 0 : index
    %139 = vector.load %arg10[%c64, %c0_106] : memref<72x128xf32, #tpu.memory_space<vmem>>, vector<8x128xf32>
    tpu.vector_store %arg10[%c64, %c0_106], %138 {strides = array<i32>} : memref<72x128xf32, #tpu.memory_space<vmem>>, vector<8x128xf32>,
    %c0_107 = arith.constant 0 : index
    %c0_108 = arith.constant 0 : index
    %140 = vector.load %arg5[%c0_107, %c0_108] : memref<8x72xf32, #tpu.memory_space<vmem>>, vector<8x72xf32>
    %c0_109 = arith.constant 0 : index
    %c0_110 = arith.constant 0 : index
    %141 = vector.load %arg10[%c0_109, %c0_110] : memref<72x128xf32, #tpu.memory_space<vmem>>, vector<72x128xf32>
    %cst_111 = arith.constant dense<0.000000e+00> : vector<8x128xf32>
    %142 = tpu.matmul %140, %141, %cst_111 {dimension_numbers = #tpu.dot_dimension_numbers<[1], [0], [0], [1], [0, 0, 1, 1], [], []>, precision = #tpu.contract_precision<fp32>} : vector<8x72xf32>, vector<72x128xf32>, vector<8x128xf32> -> vector<8x128xf32>
    %cst_112 = arith.constant dense<0.000000e+00> : vector<8xf32>
    %143 = vector.multi_reduction <add>, %142, %cst_112 [1] : vector<8x128xf32> to vector<8xf32>
    %144 = vector.shape_cast %143 : vector<8xf32> to vector<8x1xf32>
    %cst_113 = arith.constant 7.812500e-03 : f32
    %145 = vector.broadcast %cst_113 : f32 to vector<8x1xf32>
    %146 = arith.mulf %144, %145 : vector<8x1xf32>
    %147 = arith.mulf %142, %142 : vector<8x128xf32>
    %cst_114 = arith.constant dense<0.000000e+00> : vector<8xf32>
    %148 = vector.multi_reduction <add>, %147, %cst_114 [1] : vector<8x128xf32> to vector<8xf32>
    %149 = vector.shape_cast %148 : vector<8xf32> to vector<8x1xf32>
    %cst_115 = arith.constant 7.812500e-03 : f32
    %150 = vector.broadcast %cst_115 : f32 to vector<8x1xf32>
    %151 = arith.mulf %149, %150 : vector<8x1xf32>
    %152 = arith.mulf %146, %146 : vector<8x1xf32>
    %153 = arith.subf %151, %152 : vector<8x1xf32>
    %154 = vector.broadcast %146 : vector<8x1xf32> to vector<8x128xf32>
    %155 = arith.subf %142, %154 : vector<8x128xf32>
    %cst_116 = arith.constant 9.99999974E-6 : f32
    %156 = vector.broadcast %cst_116 : f32 to vector<8x1xf32>
    %157 = arith.addf %153, %156 : vector<8x1xf32>
    %158 = math.rsqrt %157 : vector<8x1xf32>
    %159 = vector.broadcast %158 : vector<8x1xf32> to vector<8x128xf32>
    %160 = arith.mulf %155, %159 : vector<8x128xf32>
    %161 = vector.broadcast %89 : vector<8x1xf32> to vector<8x128xf32>
    %162 = arith.mulf %160, %161 : vector<8x128xf32>
    %163 = vector.broadcast %90 : vector<8x1xf32> to vector<8x128xf32>
    %164 = arith.addf %162, %163 : vector<8x128xf32>
    %cst_117 = arith.constant 0.000000e+00 : f32
    %165 = vector.broadcast %cst_117 : f32 to vector<8x128xf32>
    %166 = arith.maximumf %164, %165 : vector<8x128xf32>
    %c0_118 = arith.constant 0 : index
    %c0_119 = arith.constant 0 : index
    %167 = vector.load %arg8[%c0_118, %c0_119] : memref<8x128xf32, #tpu.memory_space<vmem>>, vector<8x128xf32>
    tpu.vector_store %arg8[%c0_118, %c0_119], %166 {strides = array<i32>} : memref<8x128xf32, #tpu.memory_space<vmem>>, vector<8x128xf32>,
    return
  }
}

</mosaic_0001>

<bundles_post_ra>
// kernel: downblock_pallas.1
= control target key start
LH: loop header
LB: loop body
LE: loop exit
PB: predicated region body
PF: predicated region fallthrough
CT: control target
= control target key end

     0   :  { %s1839_s13 = smov 7   ;;  %s1840_s14 = smov 9   ;;  %v1841_v7 = vmov 0.0|0.0   ;;  %vm1848_vm0 = vmmov 0   ;;  %v1849_v8 = vmov 0.0   ;;  %vm143_vm1 = vcmask 293888   ;;  %s2213_s0 = inlined_call_operand.vmem [shape: f32[2,2,4,128], index: 0, kind: input, shape index: {}]   ;;  %s2214_s1 = inlined_call_operand.vmem [shape: f32[9,1,128], index: 1, kind: input, shape index: {}]   ;;  %s2215_s2 = inlined_call_operand.vmem [shape: f32[8,36], index: 2, kind: input, shape index: {}]   ;;  %s2216_s4 = inlined_call_operand.vmem [shape: f32[8,1], index: 4, kind: input, shape index: {}]   ;;  %s2217_s3 = inlined_call_operand.vmem [shape: f32[8,1], index: 3, kind: input, shape index: {}]   ;;  %s2218_s5 = inlined_call_operand.vmem [shape: f32[8,72], index: 5, kind: input, shape index: {}]   ;;  %s2219_s7 = inlined_call_operand.vmem [shape: f32[8,1], index: 7, kind: input, shape index: {}]   ;;  %s2220_s6 = inlined_call_operand.vmem [shape: f32[8,1], index: 6, kind: input, shape index: {}]   ;;  %s2221_s8 = inlined_call_operand.vmem [shape: f32[8,128], index: 8, kind: output, shape index: {}]  }
   0x1   :  { %v29_v0 = vld [vmem:[%s2213_s0] sm:$0xf]  ;;  %v1361_v1 = vld [vmem:[%s2213_s0 + $0x4] sm:$0xf]  ;;  %v1362_v2 = vld [vmem:[%s2213_s0 + $0x8] sm:$0xf]  ;;  %1694 = vmatprep.subr.bf16.mxu0 %v1841_v7  ;;  %1742 = vmatprep.subr.bf16.mxu1 %v1841_v7 }
   0x2   :  { %v32_v3 = vmax.f32 %v29_v0, %v1361_v1  ;;  %v1363_v4 = vld [vmem:[%s2213_s0 + $0xc] sm:$0xf]  ;;  %s1842_s15 = smov 1   ;;  %s1843_s16 = smov 8   ;;  %1500 = vmatprep.mubr.msk.f32.mxu0 %vm1848_vm0, %v1849_v8  ;;  %1607 = vmatprep.mubr.msk.f32.mxu1 %vm1848_vm0, %v1849_v8  ;;  %v1925_v9 = vld [vmem:[%s2214_s1 + $0x2] ss:$0 sm:$0xff] }
   0x3   :  { %v37_v5 = vmax.f32 %v1362_v2, %v1363_v4  ;;  %s1844_s0 = smov 127   ;;  %s1845_s17 = smov 121   ;;  %v1930_v10 = vld [vmem:[%s2214_s1] ss:$0 sm:$0xff]  ;;  %v1937_v15 = vld [vmem:[%s2214_s1 + $0x3] ss:$0 sm:$0xff] }
   0x4   :  { %s1846_s18 = smov 120   ;;  %s1847_s19 = smov 119   ;;  %v1942_v16 = vld [vmem:[%s2214_s1 + $0x1] ss:$0 sm:$0xff]  ;;  %v1949_v21 = vld [vmem:[%s2214_s1 + $0x5] ss:$0 sm:$0xff] }
   0x5   :  { %v38_v6 = vmax.f32 %v32_v3, %v37_v5  ;;  %v1954_v22 = vld [vmem:[%s2214_s1 + $0x6] ss:$0 sm:$0xff]  ;;  %v1964_v29 = vld [vmem:[%s2214_s1 + $0x7] ss:$0 sm:$0xff]  ;;  %v1969_v30 = vld [vmem:[%s2214_s1 + $0x8] ss:$0 sm:$0xff] }
   0x6   :  { %v137_v23 = vld [vmem:[%s2215_s2] sm:$0xff]  ;;  %vm147_vm2 = vcmask 1043456   ;;  %vm776_vm3 = vcmask 588800  }
   0x7   :  { %64 = vrot.lane.b32.xlu1 %v38_v6, %s1839_s13  ;;  %88 = vst [vmem:[#allocation2 + $0x10] sm:$0xf] %v38_v6  ;;  %41 = vrot.lane.b32.xlu0 %v38_v6, %s1840_s14  ;;  %v145_v28 = vsel %vm143_vm1, %v137_v23, 0  ;;  %v1850_v23 = vmov 0  }
   0x8   :  { %v1971_v33 = vand.u32 4294901760, %v145_v28  ;;  %1833 = vset.pattern.permute.xlu0 %v1850_v23  ;;  %1834 = vset.pattern.permute.xlu1 %v1850_v23 }
   0xa   :  { %v1976_v40 = vsub.f32 %v145_v28, %v1971_v33  ;;  %v39_v28 = vld [vmem:[%s2217_s3] sm:$0xff] }
   0xb   :  { %76 = vrot.lane.b32.xlu1 %v38_v6, %s1842_s15  ;;  %52 = vrot.lane.b32.xlu0 %v38_v6, %s1843_s16 }
   0xc   :  { %v223_v48 = vand.u32 4294901760, %v1976_v40 }
   0xe   :  { %v224_v57 = vsub.f32 %v1976_v40, %v223_v48 }
   0xf   :  { %89 = vrot.lane.b32.xlu0 %v38_v6, %s1844_s0  ;;  %101 = vrot.lane.b32.xlu1 %v38_v6, %s1845_s17 }
  0x10   :  { %v225_v1 = vand.u32 4294901760, %v224_v57 }
  0x13   :  { %113 = vrot.lane.b32.xlu0 %v38_v6, %s1846_s18  ;;  %125 = vrot.lane.b32.xlu1 %v38_v6, %s1847_s19 }
  0x79   :  { %v65_v11 = vpop.permute.xlu1 %64  ;;  %v42_v12 = vpop.permute.xlu0 %41 }
  0x7a   :  { %v74_v13 = vmul.f32 %v1925_v9, %v65_v11  ;;  %v50_v14 = vmul.f32 %v1930_v10, %v42_v12 }
  0x7c   :  { %75 = vst [vmem:[#allocation2 + $0x8] sm:$0xf] %v74_v13  ;;  %51 = vst [vmem:[#allocation2] sm:$0xf] %v50_v14 }
  0x7d   :  { %v77_v17 = vpop.permute.xlu1 %76  ;;  %v53_v18 = vpop.permute.xlu0 %52 }
  0x7e   :  { %v86_v19 = vmul.f32 %v1937_v15, %v77_v17  ;;  %v62_v20 = vmul.f32 %v1942_v16, %v53_v18 }
  0x80   :  { %87 = vst [vmem:[#allocation2 + $0xc] sm:$0xf] %v86_v19  ;;  %63 = vst [vmem:[#allocation2 + $0x4] sm:$0xf] %v62_v20 }
  0x81   :  { %v90_v24 = vpop.permute.xlu0 %89  ;;  %v102_v25 = vpop.permute.xlu1 %101 }
  0x82   :  { %v99_v26 = vmul.f32 %v1949_v21, %v90_v24  ;;  %v111_v27 = vmul.f32 %v1954_v22, %v102_v25 }
  0x84   :  { %100 = vst [vmem:[#allocation2 + $0x14] sm:$0xf] %v99_v26  ;;  %112 = vst [vmem:[#allocation2 + $0x18] sm:$0xf] %v111_v27  ;;  %v40_v27 = vld [vmem:[%s2216_s4] sm:$0xff] }
  0x85   :  { %v114_v31 = vpop.permute.xlu0 %113  ;;  %v126_v32 = vpop.permute.xlu1 %125 }
  0x86   :  { %v123_v34 = vmul.f32 %v1964_v29, %v114_v31  ;;  %v135_v35 = vmul.f32 %v1969_v30, %v126_v32 }
  0x87   :  { %v138_v36 = vld [vmem:[#allocation2] sm:$0xff]  ;;  %v139_v37 = vld [vmem:[#allocation2 + $0x8] sm:$0xff] }
  0x88   :  { %124 = vst [vmem:[#allocation2 + $0x1c] sm:$0xf] %v123_v34  ;;  %136 = vst [vmem:[#allocation2 + $0x20] sm:$0xf] %v135_v35  ;;  %v152_v38 = vand.u32 4294901760, %v138_v36  ;;  %v155_v39 = vand.u32 4294901760, %v139_v37 }
  0x8a   :  { %v1978_v41 = vpack.c.bf16 %v155_v39, %v152_v38  ;;  %v1980_v42 = vsub.f32 %v138_v36, %v152_v38  ;;  %v1982_v43 = vsub.f32 %v139_v37, %v155_v39 }
  0x8b   :  { %v140_v44 = vld [vmem:[#allocation2 + $0x10] sm:$0xff] }
  0x8c   :  { %1696 = vmatpush3.bf16.msra.mxu0 %v1978_v41  ;;  %v158_v45 = vand.u32 4294901760, %v140_v44  ;;  %v234_v46 = vand.u32 4294901760, %v1980_v42  ;;  %v241_v47 = vand.u32 4294901760, %v1982_v43  ;;  %v1707_v17 = vpack.c.bf16 %v1982_v43, %v1980_v42 }
  0x8d   :  { %1697 = vmatprep.subr.bf16.mxu0 %v1841_v7 }
  0x8e   :  { %v247_v49 = vsub.f32 %v140_v44, %v158_v45  ;;  %v235_v54 = vsub.f32 %v1980_v42, %v234_v46  ;;  %v242_v55 = vsub.f32 %v1982_v43, %v241_v47  ;;  %v1719_v19 = vpack.c.bf16 %v241_v47, %v234_v46 }
  0x8f   :  { %v141_v50 = vld [vmem:[#allocation2 + $0x18] sm:$0xff]  ;;  %v142_v51 = vld [vmem:[#allocation2 + $0x20] sm:$0xf] }
  0x90   :  { %v161_v52 = vand.u32 4294901760, %v141_v50  ;;  %v149_v53 = vsel %vm147_vm2, %v142_v51, 0  ;;  %v248_v60 = vand.u32 4294901760, %v247_v49  ;;  %v236_v62 = vand.u32 4294901760, %v235_v54 }
  0x91   :  { %v1991_v56 = vand.u32 4294901760, %v149_v53  ;;  %v243_v63 = vand.u32 4294901760, %v242_v55 }
  0x92   :  { %v1698_v58 = vpack.c.bf16 %v161_v52, %v158_v45  ;;  %v254_v59 = vsub.f32 %v141_v50, %v161_v52  ;;  %v249_v2 = vsub.f32 %v247_v49, %v248_v60 }
  0x93   :  { %v261_v61 = vsub.f32 %v149_v53, %v1991_v56  ;;  %v1701_v4 = vpack.c.bf16 %v243_v63, %v236_v62 }
  0x94   :  { %1699 = vmatpush3.bf16.msra.mxu0 %v1698_v58  ;;  %v255_v0 = vand.u32 4294901760, %v254_v59  ;;  %v250_v11 = vand.u32 4294901760, %v249_v2  ;;  %v1710_v18 = vpack.c.bf16 %v254_v59, %v247_v49 }
  0x95   :  { %1498 = vmatprep.subr.mxu0 %v1849_v8  ;;  %v262_v6 = vand.u32 4294901760, %v261_v61 }
  0x96   :  { %v256_v3 = vsub.f32 %v254_v59, %v255_v0  ;;  %v1722_v20 = vpack.c.bf16 %v255_v0, %v248_v60 }
  0x97   :  { %v263_v13 = vsub.f32 %v261_v61, %v262_v6 }
  0x98   :  { %1499 = vmatpush3.msra.mxu0 %v1991_v56  ;;  %v257_v5 = vand.u32 4294901760, %v256_v3 }
  0x99   :  { %1700 = vmatprep.subr.bf16.mxu0 %v1841_v7  ;;  %1501 = vmatmul.mubr.f32.vlgmr.msra.gmra.mrb[0].mxu0 %v225_v1  ;;  %v264_v14 = vand.u32 4294901760, %v263_v13 }
  0x9a   :  { %1702 = vmatpush3.bf16.msra.mxu0 %v1701_v4  ;;  %1513 = vmatprep.mubr.msk.f32.mxu0 %vm1848_vm0, %v1849_v8  ;;  %v1704_v12 = vpack.c.bf16 %v257_v5, %v250_v11 }
  0x9b   :  { %1703 = vmatprep.subr.bf16.mxu0 %v1841_v7 }
  0x9e   :  { %1705 = vmatpush3.bf16.msra.mxu0 %v1704_v12 }
  0x9f   :  { %1511 = vmatprep.subr.mxu0 %v1849_v8 }
  0xa2   :  { %1512 = vmatpush3.msra.mxu0 %v264_v14 }
  0xa3   :  { %1706 = vmatprep.subr.bf16.mxu0 %v1841_v7  ;;  %1514 = vmatmul.mubr.f32.vlgmr.msra.gmra.mrb[0].mxu0 %v1971_v33 }
  0xa4   :  { %1708 = vmatpush3.bf16.msra.mxu0 %v1707_v17  ;;  %1526 = vmatprep.mubr.msk.f32.mxu0 %vm1848_vm0, %v1849_v8 }
  0xa5   :  { %1709 = vmatprep.subr.bf16.mxu0 %v1841_v7 }
  0xa8   :  { %1711 = vmatpush3.bf16.msra.mxu0 %v1710_v18 }
  0xa9   :  { %1524 = vmatprep.subr.mxu0 %v1849_v8 }
  0xac   :  { %1525 = vmatpush3.msra.mxu0 %v261_v61  ;;  %v766_v61 = vld [vmem:[%s2218_s5] sm:$0xff] }
  0xad   :  { %1712 = vmatprep.subr.bf16.mxu0 %v1841_v7  ;;  %1527 = vmatmul.mubr.f32.vlgmr.msra.gmra.mrb[0].mxu0 %v1976_v40  ;;  %v778_v3 = vsel %vm776_vm3, %v766_v61, 0 }
  0xae   :  { %1714 = vmatpush3.bf16.msra.mxu0 %v1978_v41  ;;  %1539 = vmatprep.mubr.msk.f32.mxu0 %vm1848_vm0, %v1849_v8 }
  0xaf   :  { %1715 = vmatprep.subr.bf16.mxu0 %v1841_v7 }
  0xb2   :  { %1717 = vmatpush3.bf16.msra.mxu0 %v1698_v58 }
  0xb3   :  { %1537 = vmatprep.subr.mxu0 %v1849_v8 }
  0xb6   :  { %1538 = vmatpush3.msra.mxu0 %v1991_v56 }
  0xb7   :  { %1718 = vmatprep.subr.bf16.mxu0 %v1841_v7  ;;  %1540 = vmatmul.mubr.f32.vlgmr.msra.gmra.mrb[0].mxu0 %v223_v48 }
  0xb8   :  { %1720 = vmatpush3.bf16.msra.mxu0 %v1719_v19  ;;  %1552 = vmatprep.mubr.msk.f32.mxu0 %vm1848_vm0, %v1849_v8 }
  0xb9   :  { %1721 = vmatprep.subr.bf16.mxu0 %v1841_v7 }
  0xbc   :  { %1723 = vmatpush3.bf16.msra.mxu0 %v1722_v20  ;;  %v2083_v20 = vand.u32 4294901760, %v778_v3 }
  0xbd   :  { %1550 = vmatprep.subr.mxu0 %v1849_v8 }
  0xc0   :  { %1551 = vmatpush3.msra.mxu0 %v262_v6 }
  0xc1   :  { %1724 = vmatprep.subr.bf16.mxu0 %v1841_v7  ;;  %1553 = vmatmul.mubr.f32.vlgmr.msra.gmra.mrb[0].mxu0 %v1971_v33 }
  0xc2   :  { %1726 = vmatpush3.bf16.msra.mxu0 %v1978_v41  ;;  %1565 = vmatprep.mubr.msk.f32.mxu0 %vm1848_vm0, %v1849_v8 }
  0xc3   :  { %1727 = vmatprep.subr.bf16.mxu0 %v1841_v7 }
  0xc6   :  { %1729 = vmatpush3.bf16.msra.mxu0 %v1698_v58 }
  0xc7   :  { %1563 = vmatprep.subr.mxu0 %v1849_v8 }
  0xca   :  { %1564 = vmatpush3.msra.mxu0 %v1991_v56 }
  0xcb   :  { %1566 = vmatmul.mubr.f32.vlgmr.msra.gmra.mrb[0].mxu0 %v1971_v33  ;;  %1730 = vmatprep.subr.bf16.mxu0 %v1841_v7 }
  0xcc   :  { %1586 = vmatprep.mubr.msk.f32.mxu0 %vm1848_vm0, %v1849_v8 }
 0x19e   :  { %v645_v24 = vpop.f32.mrb[0].mxu0 }
 0x19f   :  { %649 = vadd.xlane.f32.xlu0 %v645_v24  ;;  %v1567_v25 = vpop.f32.mrb[1].mxu0  ;;  %v652_v26 = vmul.f32 %v645_v24, %v645_v24 }
 0x1a1   :  { %653 = vadd.xlane.f32.xlu1 %v652_v26 }
 0x1b2   :  { %670 = vperm.xlu1 %1834, %v40_v27   ;;  %v2094_v27 = vsub.f32 %v778_v3, %v2083_v20 }
 0x1b5   :  { %664 = vperm.xlu0 %1833, %v39_v28  }
 0x22c   :  { %v650_v31 = vpop.xlane.xlu0 %649 }
 0x22d   :  { %v651_v32 = vmul.f32 0.0078125, %v650_v31 }
 0x22e   :  { %v654_v33 = vpop.xlane.xlu1 %653 }
 0x22f   :  { %v656_v34 = vmul.f32 %v651_v32, %v651_v32  ;;  %v655_v35 = vmul.f32 0.0078125, %v654_v33  ;;  %v658_v38 = vsub.f32 %v645_v24, %v651_v32 }
 0x231   :  { %v657_v36 = vsub.f32 %v655_v35, %v656_v34  ;;  %v856_v35 = vand.u32 4294901760, %v2094_v27 }
 0x232   :  { %v671_v42 = vpop.permute.xlu1 %670 }
 0x233   :  { %v659_v37 = vadd.f32 1e-05, %v657_v36 }
 0x234   :  { %v665_v40 = vpop.permute.xlu0 %664 }
 0x235   :  { %1835 = vrsqrt.f32 %v659_v37 }
 0x23f   :  { %v1836_v39 = vpop.eup %1835 }
 0x240   :  { %v661_v41 = vmul.f32 %v1836_v39, %v658_v38 }
 0x242   :  { %v667_v43 = vmul.f32 %v665_v40, %v661_v41  ;;  %v857_v41 = vsub.f32 %v2094_v27, %v856_v35 }
 0x244   :  { %v673_v44 = vadd.f32 %v671_v42, %v667_v43 }
 0x246   :  { %v674_v45 = vmax.f32 %v673_v44, 0.0 }
 0x248   :  { %744 = vrot.lane.b32.xlu0 %v674_v45, %s1846_s18  ;;  %677 = vrot.lane.b32.xlu1 %v674_v45, %s1840_s14  ;;  %v793_v63 = vand.u32 4294901760, %v674_v45 }
 0x24a   :  { %v2074_v13 = vsub.f32 %v674_v45, %v793_v63 }
 0x24c   :  { %688 = vrot.lane.b32.xlu1 %v674_v45, %s1843_s16 }
 0x250   :  { %699 = vrot.lane.b32.xlu1 %v674_v45, %s1839_s13 }
 0x254   :  { %710 = vrot.lane.b32.xlu1 %v674_v45, %s1842_s15 }
 0x258   :  { %722 = vrot.lane.b32.xlu1 %v674_v45, %s1844_s0 }
 0x25c   :  { %733 = vrot.lane.b32.xlu1 %v674_v45, %s1845_s17 }
 0x260   :  { %755 = vrot.lane.b32.xlu1 %v674_v45, %s1847_s19 }
 0x2ba   :  { %v678_v46 = vpop.permute.xlu1 %677  ;;  %v745_v52 = vpop.permute.xlu0 %744 }
 0x2bb   :  { %v686_v47 = vmul.f32 %v1930_v10, %v678_v46  ;;  %v753_v59 = vmul.f32 %v1964_v29, %v745_v52  ;;  %v858_v52 = vand.u32 4294901760, %v857_v41 }
 0x2bd   :  { %v781_v48 = vand.u32 4294901760, %v686_v47  ;;  %v802_v2 = vand.u32 4294901760, %v753_v59 }
 0x2be   :  { %v689_v49 = vpop.permute.xlu1 %688 }
 0x2bf   :  { %v2050_v50 = vsub.f32 %v686_v47, %v781_v48  ;;  %v697_v51 = vmul.f32 %v1942_v16, %v689_v49  ;;  %v2081_v19 = vsub.f32 %v753_v59, %v802_v2 }
 0x2c1   :  { %v784_v53 = vand.u32 4294901760, %v697_v51  ;;  %v867_v54 = vand.u32 4294901760, %v2050_v50  ;;  %v916_v34 = vand.u32 4294901760, %v2081_v19 }
 0x2c2   :  { %v700_v55 = vpop.permute.xlu1 %699 }
 0x2c3   :  { %v2054_v56 = vpack.c.bf16 %v784_v53, %v781_v48  ;;  %v2056_v57 = vsub.f32 %v697_v51, %v784_v53  ;;  %v708_v58 = vmul.f32 %v1925_v9, %v700_v55  ;;  %v868_v60 = vsub.f32 %v2050_v50, %v867_v54 }
 0x2c4   :  { %v917_v49 = vsub.f32 %v2081_v19, %v916_v34 }
 0x2c5   :  { %v787_v10 = vand.u32 4294901760, %v708_v58  ;;  %1732 = vmatpush3.bf16.msra.mxu0 %v2054_v56  ;;  %v874_v16 = vand.u32 4294901760, %v2056_v57  ;;  %v869_v6 = vand.u32 4294901760, %v868_v60 }
 0x2c6   :  { %v711_v62 = vpop.permute.xlu1 %710  ;;  %1733 = vmatprep.subr.bf16.mxu0 %v1841_v7  ;;  %v918_v59 = vand.u32 4294901760, %v917_v49 }
 0x2c7   :  { %v2067_v0 = vsub.f32 %v708_v58, %v787_v10  ;;  %v719_v9 = vmul.f32 %v1937_v15, %v711_v62  ;;  %v875_v29 = vsub.f32 %v2056_v57, %v874_v16  ;;  %v2071_v1 = vpack.c.bf16 %v874_v16, %v867_v54 }
 0x2c8   :  { %v1755_v62 = vpack.c.bf16 %v2056_v57, %v2050_v50 }
 0x2c9   :  { %v881_v4 = vand.u32 4294901760, %v2067_v0  ;;  %v790_v5 = vand.u32 4294901760, %v719_v9  ;;  %v876_v11 = vand.u32 4294901760, %v875_v29 }
 0x2ca   :  { %v723_v12 = vpop.permute.xlu1 %722 }
 0x2cb   :  { %v2076_v14 = vpack.c.bf16 %v790_v5, %v787_v10  ;;  %v2078_v17 = vsub.f32 %v719_v9, %v790_v5  ;;  %v731_v15 = vmul.f32 %v1949_v21, %v723_v12  ;;  %v1743_v18 = vpack.c.bf16 %v876_v11, %v869_v6 }
 0x2cc   :  { %v882_v25 = vsub.f32 %v2067_v0, %v881_v4  ;;  %v895_v21 = vand.u32 4294901760, %v2074_v13 }
 0x2cd   :  { %v888_v23 = vand.u32 4294901760, %v2078_v17  ;;  %v796_v24 = vand.u32 4294901760, %v731_v15  ;;  %1735 = vmatpush3.bf16.msra.mxu0 %v2076_v14  ;;  %1744 = vmatpush3.bf16.msra.mxu1 %v1743_v18 }
 0x2ce   :  { %v734_v26 = vpop.permute.xlu1 %733  ;;  %1736 = vmatprep.subr.bf16.mxu0 %v1841_v7  ;;  %1745 = vmatprep.subr.bf16.mxu1 %v1841_v7  ;;  %v883_v38 = vand.u32 4294901760, %v882_v25 }
 0x2cf   :  { %v2096_v28 = vpack.c.bf16 %v796_v24, %v793_v63  ;;  %v2098_v31 = vsub.f32 %v731_v15, %v796_v24  ;;  %v742_v32 = vmul.f32 %v1954_v22, %v734_v26  ;;  %v889_v33 = vsub.f32 %v2078_v17, %v888_v23 }
 0x2d0   :  { %v896_v22 = vsub.f32 %v2074_v13, %v895_v21  ;;  %v1758_v63 = vpack.c.bf16 %v2078_v17, %v2067_v0  ;;  %v1782_v9 = vpack.c.bf16 %v888_v23, %v881_v4 }
 0x2d1   :  { %v902_v36 = vand.u32 4294901760, %v2098_v31  ;;  %v799_v37 = vand.u32 4294901760, %v742_v32  ;;  %1738 = vmatpush3.bf16.msra.mxu0 %v2096_v28  ;;  %v890_v39 = vand.u32 4294901760, %v889_v33  ;;  %v1761_v50 = vpack.c.bf16 %v2098_v31, %v2074_v13 }
 0x2d2   :  { %v756_v40 = vpop.permute.xlu1 %755  ;;  %1739 = vmatprep.subr.bf16.mxu0 %v1841_v7 }
 0x2d3   :  { %v2115_v42 = vpack.c.bf16 %v802_v2, %v799_v37  ;;  %v2117_v43 = vsub.f32 %v742_v32, %v799_v37  ;;  %v764_v44 = vmul.f32 %v1969_v30, %v756_v40  ;;  %v1746_v45 = vpack.c.bf16 %v890_v39, %v883_v38 }
 0x2d4   :  { %v903_v46 = vsub.f32 %v2098_v31, %v902_v36  ;;  %v897_v30 = vand.u32 4294901760, %v896_v22  ;;  %v1785_v29 = vpack.c.bf16 %v902_v36, %v895_v21 }
 0x2d5   :  { %v909_v47 = vand.u32 4294901760, %v2117_v43  ;;  %v2124_v48 = vand.u32 4294901760, %v764_v44  ;;  %1741 = vmatpush3.bf16.msra.mxu0 %v2115_v42  ;;  %1747 = vmatpush3.bf16.msra.mxu1 %v1746_v45  ;;  %v1764_v57 = vpack.c.bf16 %v2081_v19, %v2117_v43 }
 0x2d6   :  { %1584 = vmatprep.subr.mxu0 %v1849_v8  ;;  %1748 = vmatprep.subr.bf16.mxu1 %v1841_v7  ;;  %v904_v51 = vand.u32 4294901760, %v903_v46 }
 0x2d7   :  { %v922_v53 = vsub.f32 %v764_v44, %v2124_v48  ;;  %v910_v54 = vsub.f32 %v2117_v43, %v909_v47 }
 0x2d8   :  { %v1749_v55 = vpack.c.bf16 %v904_v51, %v897_v30 }
 0x2d9   :  { %1585 = vmatpush3.msra.mxu0 %v2124_v48  ;;  %v911_v58 = vand.u32 4294901760, %v910_v54  ;;  %v923_v10 = vand.u32 4294901760, %v922_v53 }
 0x2da   :  { %1750 = vmatpush3.bf16.msra.mxu1 %v1749_v55  ;;  %1587 = vmatmul.mubr.f32.vlgmr.msra.gmra.mrb[2].mxu0 %v858_v52 }
 0x2db   :  { %1751 = vmatprep.subr.bf16.mxu1 %v1841_v7  ;;  %v1752_v60 = vpack.c.bf16 %v918_v59, %v911_v58  ;;  %v924_v16 = vsub.f32 %v922_v53, %v923_v10 }
 0x2dd   :  { %v925_v61 = vand.u32 4294901760, %v924_v16 }
 0x2de   :  { %1753 = vmatpush3.bf16.msra.mxu1 %v1752_v60 }
 0x2df   :  { %1605 = vmatprep.subr.mxu1 %v1849_v8 }
 0x2e2   :  { %1606 = vmatpush3.msra.mxu1 %v925_v61 }
 0x2e3   :  { %1754 = vmatprep.subr.bf16.mxu1 %v1841_v7  ;;  %1608 = vmatmul.mubr.f32.vlgmr.msra.gmra.mrb[0].mxu1 %v2083_v20 }
 0x2e4   :  { %1756 = vmatpush3.bf16.msra.mxu1 %v1755_v62  ;;  %1628 = vmatprep.mubr.msk.f32.mxu1 %vm1848_vm0, %v1849_v8 }
 0x2e5   :  { %1757 = vmatprep.subr.bf16.mxu1 %v1841_v7 }
 0x2e8   :  { %1759 = vmatpush3.bf16.msra.mxu1 %v1758_v63 }
 0x2e9   :  { %1760 = vmatprep.subr.bf16.mxu1 %v1841_v7 }
 0x2ec   :  { %1762 = vmatpush3.bf16.msra.mxu1 %v1761_v50 }
 0x2ed   :  { %1763 = vmatprep.subr.bf16.mxu1 %v1841_v7 }
 0x2f0   :  { %1765 = vmatpush3.bf16.msra.mxu1 %v1764_v57 }
 0x2f1   :  { %1626 = vmatprep.subr.mxu1 %v1849_v8 }
 0x2f4   :  { %1627 = vmatpush3.msra.mxu1 %v922_v53 }
 0x2f5   :  { %1766 = vmatprep.subr.bf16.mxu1 %v1841_v7  ;;  %1629 = vmatmul.mubr.f32.vlgmr.msra.gmra.mrb[0].mxu1 %v2094_v27 }
 0x2f6   :  { %1768 = vmatpush3.bf16.msra.mxu1 %v2054_v56  ;;  %1649 = vmatprep.mubr.msk.f32.mxu1 %vm1848_vm0, %v1849_v8 }
 0x2f7   :  { %1769 = vmatprep.subr.bf16.mxu1 %v1841_v7 }
 0x2fa   :  { %1771 = vmatpush3.bf16.msra.mxu1 %v2076_v14 }
 0x2fb   :  { %1772 = vmatprep.subr.bf16.mxu1 %v1841_v7 }
 0x2fe   :  { %1774 = vmatpush3.bf16.msra.mxu1 %v2096_v28 }
 0x2ff   :  { %1775 = vmatprep.subr.bf16.mxu1 %v1841_v7 }
 0x302   :  { %1777 = vmatpush3.bf16.msra.mxu1 %v2115_v42 }
 0x303   :  { %1647 = vmatprep.subr.mxu1 %v1849_v8 }
 0x306   :  { %1648 = vmatpush3.msra.mxu1 %v2124_v48 }
 0x307   :  { %1778 = vmatprep.subr.bf16.mxu1 %v1841_v7  ;;  %1650 = vmatmul.mubr.f32.vlgmr.msra.gmra.mrb[0].mxu1 %v856_v35 }
 0x308   :  { %1780 = vmatpush3.bf16.msra.mxu1 %v2071_v1  ;;  %1670 = vmatprep.mubr.msk.f32.mxu1 %vm1848_vm0, %v1849_v8  ;;  %v1788_v1 = vpack.c.bf16 %v916_v34, %v909_v47 }
 0x309   :  { %1781 = vmatprep.subr.bf16.mxu1 %v1841_v7 }
 0x30c   :  { %1783 = vmatpush3.bf16.msra.mxu1 %v1782_v9 }
 0x30d   :  { %1784 = vmatprep.subr.bf16.mxu1 %v1841_v7 }
 0x310   :  { %1786 = vmatpush3.bf16.msra.mxu1 %v1785_v29 }
 0x311   :  { %1787 = vmatprep.subr.bf16.mxu1 %v1841_v7 }
 0x314   :  { %1789 = vmatpush3.bf16.msra.mxu1 %v1788_v1 }
 0x315   :  { %1668 = vmatprep.subr.mxu1 %v1849_v8 }
 0x318   :  { %1669 = vmatpush3.msra.mxu1 %v923_v10 }
 0x319   :  { %1790 = vmatprep.subr.bf16.mxu1 %v1841_v7  ;;  %1671 = vmatmul.mubr.f32.vlgmr.msra.gmra.mrb[0].mxu1 %v2083_v20 }
 0x31a   :  { %1792 = vmatpush3.bf16.msra.mxu1 %v2054_v56  ;;  %1691 = vmatprep.mubr.msk.f32.mxu1 %vm1848_vm0, %v1849_v8 }
 0x31b   :  { %1793 = vmatprep.subr.bf16.mxu1 %v1841_v7 }
 0x31e   :  { %1795 = vmatpush3.bf16.msra.mxu1 %v2076_v14 }
 0x31f   :  { %1796 = vmatprep.subr.bf16.mxu1 %v1841_v7 }
 0x322   :  { %1798 = vmatpush3.bf16.msra.mxu1 %v2096_v28 }
 0x323   :  { %1799 = vmatprep.subr.bf16.mxu1 %v1841_v7  ;;  %v676_v7 = vld [vmem:[%s2219_s7] sm:$0xff] }
 0x326   :  { %1801 = vmatpush3.bf16.msra.mxu1 %v2115_v42 }
 0x327   :  { %1689 = vmatprep.subr.mxu1 %v1849_v8  ;;  %v675_v8 = vld [vmem:[%s2220_s6] sm:$0xff] }
 0x32a   :  { %1690 = vmatpush3.msra.mxu1 %v2124_v48 }
 0x32b   :  { %1692 = vmatmul.mubr.f32.vlgmr.msra.gmra.mrb[0].mxu1 %v2083_v20 }
 0x3ad   :  { %v860_v56 = vpop.f32.mrb[2].mxu0 }
 0x3ae   :  { %v1588_v0 = vpop.f32.mrb[3].mxu0 }
 0x3fe   :  { %v1326_v2 = vpop.f32.mrb[0].mxu1 }
 0x3ff   :  { %v1802_v3 = vadd.f32 %v1326_v2, %v860_v56  ;;  %v1693_v4 = vpop.f32.mrb[1].mxu1 }
 0x401   :  { %1330 = vadd.xlane.f32.xlu0 %v1802_v3  ;;  %v1333_v5 = vmul.f32 %v1802_v3, %v1802_v3 }
 0x403   :  { %1334 = vadd.xlane.f32.xlu1 %v1333_v5 }
 0x414   :  { %1351 = vperm.xlu1 %1834, %v676_v7  }
 0x417   :  { %1345 = vperm.xlu0 %1833, %v675_v8  }
 0x48e   :  { %v1331_v6 = vpop.xlane.xlu0 %1330 }
 0x48f   :  { %v1332_v11 = vmul.f32 0.0078125, %v1331_v6 }
 0x490   :  { %v1335_v12 = vpop.xlane.xlu1 %1334 }
 0x491   :  { %v1337_v13 = vmul.f32 %v1332_v11, %v1332_v11  ;;  %v1336_v14 = vmul.f32 0.0078125, %v1335_v12  ;;  %v1339_v18 = vsub.f32 %v1802_v3, %v1332_v11 }
 0x493   :  { %v1338_v17 = vsub.f32 %v1336_v14, %v1337_v13 }
 0x494   :  { %v1352_v25 = vpop.permute.xlu1 %1351 }
 0x495   :  { %v1340_v15 = vadd.f32 1e-05, %v1338_v17 }
 0x496   :  { %v1346_v23 = vpop.permute.xlu0 %1345 }
 0x497   :  { %1837 = vrsqrt.f32 %v1340_v15 }
 0x4a1   :  { %v1838_v19 = vpop.eup %1837 }
 0x4a2   :  { %v1342_v20 = vmul.f32 %v1838_v19, %v1339_v18 }
 0x4a4   :  { %v1348_v24 = vmul.f32 %v1346_v23, %v1342_v20 }
 0x4a6   :  { %v1354_v26 = vadd.f32 %v1352_v25, %v1348_v24 }
 0x4a8   :  { %v1355_v21 = vmax.f32 %v1354_v26, 0.0 }
 0x4aa   :  { %1356 = vst [vmem:[%s2221_s8] sm:$0xff] %v1355_v21 }

</bundles_post_ra>
